<compile_context>
chip_gen: v6e
topology: v6e:2x2x1
jax: 0.10.0
libtpu: 0.0.40
codegen_flags: <defaults>
</compile_context>

<pallas_src>
import functools

import jax
import jax.numpy as jnp
from jax.experimental import pallas as pl
from jax.experimental.pallas import tpu as pltpu

_HIDDEN = 64
_OUT = 3
_OUT_PAD = 128  # lane-dense output width (multiple of 128)


def _round_up(n, m):
    return ((n + m - 1) // m) * m


def _mlp_kernel(x_ref, w1_ref, b1_ref, w2_ref, b2_ref, w3_ref, b3_ref, o_ref):
    # Entire 3-layer MLP fused in one kernel: 2 MXU matmuls + VPU/EUP elementwise.
    x = x_ref[...].astype(jnp.float32)                                   # (TB, 1)

    # Layer 1: contraction depth is 1, so a lane-broadcast multiply-add on the
    # VPU is exact and avoids a degenerate K=1 MXU push.
    h1 = jnp.tanh(x * w1_ref[...] + b1_ref[...])                         # (TB, 64)

    # Layer 2: (TB, 64) @ (64, 64) on the MXU, f32 accumulation.
    h2 = jnp.dot(h1, w2_ref[...], preferred_element_type=jnp.float32)    # (TB, 64)
    h2 = jnp.tanh(h2 + b2_ref[...])

    # Layer 3: (TB, 64) @ (64, 128) (zero-padded to full lane width).
    z = jnp.dot(h2, w3_ref[...], preferred_element_type=jnp.float32)     # (TB, 128)
    z = z + b3_ref[...]
    o_ref[...] = jax.nn.sigmoid(z).astype(o_ref.dtype)


@functools.partial(jax.jit, static_argnames=("max_batch_tile",))
def net_sir_forward(x, params, *, max_batch_tile=512):
    """x: (N, 1) float32. params: dict w1,b1,w2,b2,w3,b3. Returns (N, 3)."""
    w1, b1 = params["w1"], params["b1"]   # (1, 64),  (1, 64)
    w2, b2 = params["w2"], params["b2"]   # (64, 64), (1, 64)
    w3, b3 = params["w3"], params["b3"]   # (64, 3),  (1, 3)

    n = x.shape[0]

    # Adaptive batch tile: big enough to amortize per-grid-step overhead,
    # never bigger than needed for small batches.  Always a multiple of 8.
    tb = min(max_batch_tile, _round_up(max(n, 8), 8))
    n_pad = _round_up(n, tb)
    grid = (n_pad // tb,)

    # Pad batch (zeros) so any N works; pad layer-3 weights/bias to a
    # lane-dense 128-wide output (padded lanes are sliced away below).
    x_p = jnp.pad(x, ((0, n_pad - n), (0, 0)))
    w3_p = jnp.pad(w3, ((0, 0), (0, _OUT_PAD - _OUT)))
    b3_p = jnp.pad(b3, ((0, 0), (0, _OUT_PAD - _OUT)))

    const = lambda shape: pl.BlockSpec(shape, lambda i: (0, 0))

    flops_per_row = 2 * _HIDDEN + 2 * _HIDDEN * _HIDDEN + 2 * _HIDDEN * _OUT_PAD
    trans_per_row = _HIDDEN + _HIDDEN + _OUT_PAD
    weight_bytes = 4 * (_HIDDEN + _HIDDEN * _HIDDEN + _HIDDEN * _OUT_PAD
                        + 2 * _HIDDEN + _OUT_PAD)
    cost = pl.CostEstimate(
        flops=n_pad * flops_per_row,
        transcendentals=n_pad * trans_per_row,
        bytes_accessed=4 * n_pad * (1 + _OUT_PAD) + weight_bytes,
    )

    out_padded = pl.pallas_call(
        _mlp_kernel,
        out_shape=jax.ShapeDtypeStruct((n_pad, _OUT_PAD), x.dtype),
        grid_spec=pltpu.PrefetchScalarGridSpec(
            num_scalar_prefetch=0,
            grid=grid,
            in_specs=[
                pl.BlockSpec((tb, 1), lambda i: (i, 0)),   # x tile
                const(w1.shape), const(b1.shape),
                const(w2.shape), const(b2.shape),
                const(w3_p.shape), const(b3_p.shape),
            ],
            out_specs=pl.BlockSpec((tb, _OUT_PAD), lambda i: (i, 0)),
        ),
        compiler_params=pltpu.CompilerParams(
            dimension_semantics=("parallel",),
        ),
        cost_estimate=cost,
    )(x_p, w1, b1, w2, b2, w3_p, b3_p)

    return out_padded[:n, :_OUT]


def init_params(key):
    """Deterministic synthetic init matching nn.Linear shapes (weights transposed)."""
    k1, k2, k3, k4, k5, k6 = jax.random.split(key, 6)

    # PyTorch nn.Linear(in, out) default init: U(-1/sqrt(in), 1/sqrt(in))
    def u(k, shape, fan_in):
        bound = 1.0 / jnp.sqrt(float(fan_in))
        return jax.random.uniform(k, shape, jnp.float32, -bound, bound)

    return {
        "w1": u(k1, (1, 64), 1),    "b1": u(k2, (1, 64), 1),
        "w2": u(k3, (64, 64), 64),  "b2": u(k4, (1, 64), 64),
        "w3": u(k5, (64, 3), 64),   "b3": u(k6, (1, 3), 64),
    }


def reference_forward(x, p):
    hp = jax.lax.Precision.HIGHEST
    h1 = jnp.tanh(x @ p["w1"] + p["b1"])
    h2 = jnp.tanh(jnp.dot(h1, p["w2"], precision=hp) + p["b2"])
    return jax.nn.sigmoid(jnp.dot(h2, p["w3"], precision=hp) + p["b3"])


if __name__ == "__main__":
    key = jax.random.PRNGKey(0)
    kp, kx = jax.random.split(key)
    params = init_params(kp)

    # Small input consistent with the module: (batch, 1) time values.
    # Deliberately NOT a multiple of 8 to exercise the padded-grid path.
    x = jax.random.uniform(kx, (10, 1), jnp.float32)

    out = jax.block_until_ready(net_sir_forward(x, params))
    ref = reference_forward(x, params)

    assert out.shape == (10, 3)
    assert jnp.allclose(out, ref, atol=2e-4, rtol=2e-4), "mismatch vs reference"

    print("KERNEL_OK")
</pallas_src>

<mosaic_0001>
module attributes {stable_mosaic.version = 11 : i64} {
  func.func @_mlp_kernel(%arg0: i32, %arg1: memref<16x1xf32, #tpu.memory_space<vmem>>, %arg2: memref<1x64xf32, #tpu.memory_space<vmem>>, %arg3: memref<1x64xf32, #tpu.memory_space<vmem>>, %arg4: memref<64x64xf32, #tpu.memory_space<vmem>>, %arg5: memref<1x64xf32, #tpu.memory_space<vmem>>, %arg6: memref<64x128xf32, #tpu.memory_space<vmem>>, %arg7: memref<1x128xf32, #tpu.memory_space<vmem>>, %arg8: memref<16x128xf32, #tpu.memory_space<vmem>>) attributes {dimension_semantics = [#tpu.dimension_semantics<parallel>], iteration_bounds = array<i64: 1>, scalar_prefetch = 0 : i64, scratch_operands = 0 : i64, tpu.core_type = #tpu.core_type<tc>, window_params = [{transform_indices = @transform_0, window_bounds = array<i64: 16, 1>}, {pipeline_mode = #tpu.pipeline_mode<synchronous>, transform_indices = @transform_1, window_bounds = array<i64: 1, 64>}, {pipeline_mode = #tpu.pipeline_mode<synchronous>, transform_indices = @transform_2, window_bounds = array<i64: 1, 64>}, {pipeline_mode = #tpu.pipeline_mode<synchronous>, transform_indices = @transform_3, window_bounds = array<i64: 64, 64>}, {pipeline_mode = #tpu.pipeline_mode<synchronous>, transform_indices = @transform_4, window_bounds = array<i64: 1, 64>}, {pipeline_mode = #tpu.pipeline_mode<synchronous>, transform_indices = @transform_5, window_bounds = array<i64: 64, 128>}, {pipeline_mode = #tpu.pipeline_mode<synchronous>, transform_indices = @transform_6, window_bounds = array<i64: 1, 128>}, {transform_indices = @transform_7, window_bounds = array<i64: 16, 128>}]} {
    %c0 = arith.constant 0 : index
    %c0_0 = arith.constant 0 : index
    %0 = vector.load %arg1[%c0, %c0_0] : memref<16x1xf32, #tpu.memory_space<vmem>>, vector<16x1xf32>
    %c0_1 = arith.constant 0 : index
    %c0_2 = arith.constant 0 : index
    %1 = vector.load %arg2[%c0_1, %c0_2] : memref<1x64xf32, #tpu.memory_space<vmem>>, vector<1x64xf32>
    %2 = vector.broadcast %0 : vector<16x1xf32> to vector<16x64xf32>
    %3 = vector.broadcast %1 : vector<1x64xf32> to vector<16x64xf32>
    %4 = arith.mulf %2, %3 : vector<16x64xf32>
    %c0_3 = arith.constant 0 : index
    %c0_4 = arith.constant 0 : index
    %5 = vector.load %arg3[%c0_3, %c0_4] : memref<1x64xf32, #tpu.memory_space<vmem>>, vector<1x64xf32>
    %6 = vector.broadcast %5 : vector<1x64xf32> to vector<16x64xf32>
    %7 = arith.addf %4, %6 : vector<16x64xf32>
    %8 = math.tanh %7 : vector<16x64xf32>
    %c0_5 = arith.constant 0 : index
    %c0_6 = arith.constant 0 : index
    %9 = vector.load %arg4[%c0_5, %c0_6] : memref<64x64xf32, #tpu.memory_space<vmem>>, vector<64x64xf32>
    %cst = arith.constant dense<0.000000e+00> : vector<16x64xf32>
    %10 = tpu.matmul %8, %9, %cst {dimension_numbers = #tpu.dot_dimension_numbers<[1], [0], [0], [1], [0, 0, 1, 1], [], []>} : vector<16x64xf32>, vector<64x64xf32>, vector<16x64xf32> -> vector<16x64xf32>
    %c0_7 = arith.constant 0 : index
    %c0_8 = arith.constant 0 : index
    %11 = vector.load %arg5[%c0_7, %c0_8] : memref<1x64xf32, #tpu.memory_space<vmem>>, vector<1x64xf32>
    %12 = vector.broadcast %11 : vector<1x64xf32> to vector<16x64xf32>
    %13 = arith.addf %10, %12 : vector<16x64xf32>
    %14 = math.tanh %13 : vector<16x64xf32>
    %c0_9 = arith.constant 0 : index
    %c0_10 = arith.constant 0 : index
    %15 = vector.load %arg6[%c0_9, %c0_10] : memref<64x128xf32, #tpu.memory_space<vmem>>, vector<64x128xf32>
    %cst_11 = arith.constant dense<0.000000e+00> : vector<16x128xf32>
    %16 = tpu.matmul %14, %15, %cst_11 {dimension_numbers = #tpu.dot_dimension_numbers<[1], [0], [0], [1], [0, 0, 1, 1], [], []>} : vector<16x64xf32>, vector<64x128xf32>, vector<16x128xf32> -> vector<16x128xf32>
    %c0_12 = arith.constant 0 : index
    %c0_13 = arith.constant 0 : index
    %17 = vector.load %arg7[%c0_12, %c0_13] : memref<1x128xf32, #tpu.memory_space<vmem>>, vector<1x128xf32>
    %18 = vector.broadcast %17 : vector<1x128xf32> to vector<16x128xf32>
    %19 = arith.addf %16, %18 : vector<16x128xf32>
    %20 = arith.negf %19 : vector<16x128xf32>
    %21 = math.exp %20 : vector<16x128xf32>
    %cst_14 = arith.constant 1.000000e+00 : f32
    %22 = vector.broadcast %cst_14 : f32 to vector<16x128xf32>
    %23 = arith.addf %22, %21 : vector<16x128xf32>
    %24 = arith.divf %22, %23 : vector<16x128xf32>
    %c0_15 = arith.constant 0 : index
    %c0_16 = arith.constant 0 : index
    %25 = vector.load %arg8[%c0_15, %c0_16] : memref<16x128xf32, #tpu.memory_space<vmem>>, vector<16x128xf32>
    tpu.vector_store %arg8[%c0_15, %c0_16], %24 {strides = array<i32>} : memref<16x128xf32, #tpu.memory_space<vmem>>, vector<16x128xf32>,
    return
  }
  func.func @transform_0(%arg0: i32) -> (i32, i32) {
    %c0_i32 = arith.constant 0 : i32
    %c0_i32_0 = arith.constant 0 : i32
    return %arg0, %c0_i32 : i32, i32
  }
  func.func @transform_1(%arg0: i32) -> (i32, i32) {
    %c0_i32 = arith.constant 0 : i32
    %c0_i32_0 = arith.constant 0 : i32
    %c0_i32_1 = arith.constant 0 : i32
    return %c0_i32, %c0_i32_0 : i32, i32
  }
  func.func @transform_2(%arg0: i32) -> (i32, i32) {
    %c0_i32 = arith.constant 0 : i32
    %c0_i32_0 = arith.constant 0 : i32
    %c0_i32_1 = arith.constant 0 : i32
    return %c0_i32, %c0_i32_0 : i32, i32
  }
  func.func @transform_3(%arg0: i32) -> (i32, i32) {
    %c0_i32 = arith.constant 0 : i32
    %c0_i32_0 = arith.constant 0 : i32
    %c0_i32_1 = arith.constant 0 : i32
    return %c0_i32, %c0_i32_0 : i32, i32
  }
  func.func @transform_4(%arg0: i32) -> (i32, i32) {
    %c0_i32 = arith.constant 0 : i32
    %c0_i32_0 = arith.constant 0 : i32
    %c0_i32_1 = arith.constant 0 : i32
    return %c0_i32, %c0_i32_0 : i32, i32
  }
  func.func @transform_5(%arg0: i32) -> (i32, i32) {
    %c0_i32 = arith.constant 0 : i32
    %c0_i32_0 = arith.constant 0 : i32
    %c0_i32_1 = arith.constant 0 : i32
    return %c0_i32, %c0_i32_0 : i32, i32
  }
  func.func @transform_6(%arg0: i32) -> (i32, i32) {
    %c0_i32 = arith.constant 0 : i32
    %c0_i32_0 = arith.constant 0 : i32
    %c0_i32_1 = arith.constant 0 : i32
    return %c0_i32, %c0_i32_0 : i32, i32
  }
  func.func @transform_7(%arg0: i32) -> (i32, i32) {
    %c0_i32 = arith.constant 0 : i32
    %c0_i32_0 = arith.constant 0 : i32
    return %arg0, %c0_i32 : i32, i32
  }
}

</mosaic_0001>

<bundles_post_ra>
// kernel: net_sir_forward.1
= control target key start
LH: loop header
LB: loop body
LE: loop exit
PB: predicated region body
PF: predicated region fallthrough
CT: control target
= control target key end

     0   :  { %v357_v0 = vmov 0   ;;  %vm73_vm0 = vcmask 523264   ;;  %s474_s0 = inlined_call_operand.vmem [shape: f32[16,1], index: 0, kind: input, shape index: {}]   ;;  %s475_s3 = inlined_call_operand.vmem [shape: f32[64,64], index: 3, kind: input, shape index: {}]   ;;  %s476_s1 = inlined_call_operand.vmem [shape: f32[1,64], index: 1, kind: input, shape index: {}]   ;;  %s477_s2 = inlined_call_operand.vmem [shape: f32[1,64], index: 2, kind: input, shape index: {}]   ;;  %s478_s5 = inlined_call_operand.vmem [shape: f32[64,128], index: 5, kind: input, shape index: {}]   ;;  %s479_s4 = inlined_call_operand.vmem [shape: f32[1,64], index: 4, kind: input, shape index: {}]   ;;  %s480_s6 = inlined_call_operand.vmem [shape: f32[1,128], index: 6, kind: input, shape index: {}]   ;;  %s481_s7 = inlined_call_operand.vmem [shape: f32[16,128], index: 7, kind: output, shape index: {}]  }
   0x1   :  { %340 = vset.pattern.permute.xlu0 %v357_v0  ;;  %v26_v1 = vld [vmem:[%s474_s0] sm:$0xff]  ;;  %v27_v2 = vld [vmem:[%s474_s0 + $0x8] sm:$0xff]  ;;  %v65_v3 = vld [vmem:[%s475_s3 + $0x38] sm:$0xff] }
   0x2   :  { %31 = vperm.xlu0 %340, %v26_v1   ;;  %301 = vmatprep.subr.mxu0 %v65_v3  ;;  %v64_v4 = vld [vmem:[%s475_s3 + $0x30] sm:$0xff]  ;;  %v63_v5 = vld [vmem:[%s475_s3 + $0x28] sm:$0xff]  ;;  %v62_v6 = vld [vmem:[%s475_s3 + $0x20] sm:$0xff] }
   0x3   :  { %302 = vmatpush3.msra.mxu0 %v65_v3  ;;  %v61_v7 = vld [vmem:[%s475_s3 + $0x18] sm:$0xff]  ;;  %v60_v8 = vld [vmem:[%s475_s3 + $0x10] sm:$0xff]  ;;  %v59_v9 = vld [vmem:[%s475_s3 + $0x8] sm:$0xff] }
   0x4   :  { %303 = vmatprep.subr.mxu0 %v64_v4  ;;  %v58_v10 = vld [vmem:[%s475_s3] sm:$0xff]  ;;  %v164_v21 = vld [vmem:[%s478_s5 + $0x38] sm:$0xff]  ;;  %v163_v22 = vld [vmem:[%s478_s5 + $0x30] sm:$0xff] }
   0x5   :  { %304 = vmatpush3.msra.mxu0 %v64_v4  ;;  %v271_v11 = vld [vmem:[%s476_s1] ss:$0 sm:$0xff]  ;;  %320 = vmatprep.subr.mxu1 %v164_v21  ;;  %v162_v23 = vld [vmem:[%s478_s5 + $0x28] sm:$0xff]  ;;  %v160_v25 = vld [vmem:[%s478_s5 + $0x18] sm:$0xff] }
   0x6   :  { %36 = vperm.xlu0 %340, %v27_v2   ;;  %305 = vmatprep.subr.mxu0 %v63_v5  ;;  %v272_v12 = vld [vmem:[%s477_s2] ss:$0 sm:$0xff]  ;;  %v159_v26 = vld [vmem:[%s478_s5 + $0x10] sm:$0xff]  ;;  %v158_v27 = vld [vmem:[%s478_s5 + $0x8] sm:$0xff] }
   0x7   :  { %306 = vmatpush3.msra.mxu0 %v63_v5  ;;  %321 = vmatpush3.msra.mxu1 %v164_v21  ;;  %v161_v24 = vld [vmem:[%s478_s5 + $0x20] sm:$0xff] }
   0x8   :  { %307 = vmatprep.subr.mxu0 %v62_v6  ;;  %322 = vmatprep.subr.mxu1 %v163_v22  ;;  %v157_v28 = vld [vmem:[%s478_s5] sm:$0xff] }
   0x9   :  { %308 = vmatpush3.msra.mxu0 %v62_v6  ;;  %323 = vmatpush3.msra.mxu1 %v163_v22  ;;  %v273_v29 = vld [vmem:[%s479_s4] ss:$0 sm:$0xff] }
   0xa   :  { %309 = vmatprep.subr.mxu0 %v61_v7  ;;  %324 = vmatprep.subr.mxu1 %v162_v23  ;;  %v276_v36 = vld [vmem:[%s480_s6] ss:$0 sm:$0xff] }
   0xb   :  { %310 = vmatpush3.msra.mxu0 %v61_v7  ;;  %325 = vmatpush3.msra.mxu1 %v162_v23 }
   0xc   :  { %311 = vmatprep.subr.mxu0 %v60_v8  ;;  %326 = vmatprep.subr.mxu1 %v161_v24 }
   0xd   :  { %312 = vmatpush3.msra.mxu0 %v60_v8  ;;  %327 = vmatpush3.msra.mxu1 %v161_v24 }
   0xe   :  { %313 = vmatprep.subr.mxu0 %v59_v9  ;;  %328 = vmatprep.subr.mxu1 %v160_v25 }
   0xf   :  { %314 = vmatpush3.msra.mxu0 %v59_v9  ;;  %329 = vmatpush3.msra.mxu1 %v160_v25 }
  0x10   :  { %315 = vmatprep.subr.mxu0 %v58_v10  ;;  %330 = vmatprep.subr.mxu1 %v159_v26 }
  0x11   :  { %316 = vmatpush3.msra.mxu0 %v58_v10  ;;  %331 = vmatpush3.msra.mxu1 %v159_v26 }
  0x12   :  { %332 = vmatprep.subr.mxu1 %v158_v27 }
  0x13   :  { %333 = vmatpush3.msra.mxu1 %v158_v27 }
  0x14   :  { %334 = vmatprep.subr.mxu1 %v157_v28 }
  0x15   :  { %335 = vmatpush3.msra.mxu1 %v157_v28 }
  0x7d   :  { %v32_v13 = vpop.permute.xlu0 %31 }
  0x7e   :  { %v45_v14 = vmul.f32 %v271_v11, %v32_v13 }
  0x80   :  { %v54_v15 = vadd.f32 %v272_v12, %v45_v14 }
  0x81   :  { %v37_v16 = vpop.permute.xlu0 %36 }
  0x82   :  { %341 = vtanh.f32 %v54_v15  ;;  %v46_v17 = vmul.f32 %v271_v11, %v37_v16 }
  0x84   :  { %v55_v18 = vadd.f32 %v272_v12, %v46_v17 }
  0x86   :  { %343 = vtanh.f32 %v55_v18 }
  0x8f   :  { %v342_v19 = vpop.eup %341 }
  0x90   :  { %317 = vmatprep.mubr.msk.f32.mxu0 %vm73_vm0, %v342_v19 }
  0x93   :  { %v344_v20 = vpop.eup %343 }
  0x94   :  { %318 = vmatmul.mubr.msk.f32.vlgmr.msra.gmra.mxu0 %vm73_vm0, %v344_v20 }
 0x154   :  { %v319_v30 = vpop.f32.mrf.mxu0 }
 0x155   :  { %v152_v31 = vadd.f32 %v319_v30, %v273_v29 }
 0x156   :  { %v146_v32 = vpop.f32.mrf.mxu0 }
 0x157   :  { %v147_v33 = vadd.f32 %v273_v29, %v146_v32 }
 0x159   :  { %345 = vtanh.f32 %v147_v33 }
 0x15a   :  { %347 = vtanh.f32 %v152_v31 }
 0x166   :  { %v346_v34 = vpop.eup %345 }
 0x167   :  { %v348_v35 = vpop.eup %347  ;;  %336 = vmatprep.mubr.msk.f32.mxu1 %vm73_vm0, %v346_v34 }
 0x168   :  { %337 = vmatmul.mubr.msk.f32.vlgmr.msra.gmra.mxu1 %vm73_vm0, %v348_v35 }
 0x228   :  { %v338_v37 = vpop.f32.mrf.mxu1 }
 0x229   :  { %v250_v38 = vadd.f32 %v338_v37, %v276_v36 }
 0x22a   :  { %v244_v39 = vpop.f32.mrf.mxu1 }
 0x22b   :  { %v280_v40 = vmul.f32 -1.442695, %v250_v38  ;;  %v245_v41 = vadd.f32 %v276_v36, %v244_v39 }
 0x22d   :  { %349 = vpow2.f32 %v280_v40  ;;  %v279_v42 = vmul.f32 -1.442695, %v245_v41 }
 0x22f   :  { %351 = vpow2.f32 %v279_v42 }
 0x23a   :  { %v350_v43 = vpop.eup %349 }
 0x23b   :  { %v260_v44 = vadd.f32 1.0, %v350_v43 }
 0x23c   :  { %v352_v45 = vpop.eup %351 }
 0x23d   :  { %353 = vrcp.f32 %v260_v44  ;;  %v259_v46 = vadd.f32 1.0, %v352_v45 }
 0x23f   :  { %355 = vrcp.f32 %v259_v46 }
 0x24a   :  { %v354_v47 = vpop.eup %353 }
 0x24b   :  { %266 = vst [vmem:[%s481_s7 + $0x8] sm:$0xff] %v354_v47 }
 0x24c   :  { %v356_v48 = vpop.eup %355 }
 0x24d   :  { %265 = vst [vmem:[%s481_s7] sm:$0xff] %v356_v48 }

</bundles_post_ra>
